<compile_context>
chip_gen: v5e
topology: v5e:2x2
jax: 0.10.0
libtpu: 0.0.40
codegen_flags: <defaults>
</compile_context>

<pallas_src>
import jax
import jax.numpy as jnp
from jax import lax
from jax.experimental import pallas as pl
from jax.experimental.pallas import tpu as pltpu


def attn_block_kernel(x1q_ref, x1kv_ref, x2_ref, w0a_ref, e0_ref, b0_ref,
                      w1_ref, b1_ref, w2_ref, b2_ref, gamma_ref, out_ref,
                      f2_sc, x0v_sc):
    # x1q_ref : (1, c1, tq)   f32  query rows of x1 (also the residual)
    # x1kv_ref: (1, c1, hw)   bf16 full x1 (value path), resident across q
    # x2_ref  : (1, c2, hw)   bf16 full x2 (key path),   resident across q
    # w0a_ref : (c1+1, c1)    bf16 x0_conv weight with an appended zero row
    # e0_ref  : (c1+1, 1)     f32  indicator [0,..,0,1]^T -> ones row of x0v
    # b0_ref  : (c1, 1)       f32  x0_conv bias (folded in AFTER normalization)
    # w1/w2   : (hidden, c1/c2) bf16 ; b1/b2: (hidden, 1) f32 ; gamma in SMEM
    # f2_sc   : (hidden, hw)  bf16 scratch, per-batch key projection cache
    # x0v_sc  : (c1+1, hw)    bf16 scratch, per-batch [value proj ; ones] cache
    c1 = b0_ref.shape[0]

    # ---- q-invariant projections: computed once per batch (q == 0) ---------
    @pl.when(pl.program_id(1) == 0)
    def _():
        f2 = jnp.dot(w2_ref[...], x2_ref[0],
                     preferred_element_type=jnp.float32) + b2_ref[...]
        f2_sc[...] = f2.astype(jnp.bfloat16)                     # (hidden, hw)
        # Value projection WITHOUT its bias, augmented (via the zero weight
        # row + e0 bias) with a row of ones so the mix matmul below also
        # produces the softmax row-sums.
        x0v = jnp.dot(w0a_ref[...], x1kv_ref[0],
                      preferred_element_type=jnp.float32) + e0_ref[...]
        x0v_sc[...] = x0v.astype(jnp.bfloat16)                   # (c1+1, hw)

    # ---- per-query-tile attention -------------------------------------------
    x1_q = x1q_ref[0]                                            # (c1, tq) f32
    f1 = jnp.dot(w1_ref[...], x1_q.astype(jnp.bfloat16),
                 preferred_element_type=jnp.float32) + b1_ref[...]  # (hidden, tq)

    # scores s[i, j] = <f1[:, i], f2[:, j]>: contract the (small) hidden axis
    # of both operands; the only transposed MXU operand is the tiny f1 tile.
    s = lax.dot_general(f1.astype(jnp.bfloat16), f2_sc[...],
                        dimension_numbers=(((0,), (0,)), ((), ())),
                        preferred_element_type=jnp.float32)      # (tq, hw)

    # Numerically-stable, UNNORMALIZED softmax numerator. Normalization is
    # deferred past the mix matmul: (1, tq) work instead of (tq, hw).
    s = s - jnp.max(s, axis=-1, keepdims=True)
    p = jnp.exp(s).astype(jnp.bfloat16)                          # (tq, hw)

    # mixl[c, i] = sum_j x0v[c, j] * p[i, j]  (standard q.k^T MXU pattern —
    # large operands stay un-transposed). Row c1 is l[i] = sum_j p[i, j],
    # already lane-aligned with the (c1, tq) output.
    mixl = lax.dot_general(x0v_sc[...], p,
                           dimension_numbers=(((1,), (1,)), ((), ())),
                           preferred_element_type=jnp.float32)   # (c1+1, tq)
    mix = mixl[0:c1, :]
    inv_l = pl.reciprocal(mixl[c1:c1 + 1, :], approx=True)       # (1, tq)

    # b0 folded in after normalization: softmax rows sum to 1, so
    # (x0 + b0) @ attn^T == x0 @ attn^T + b0 (exact up to the approx
    # reciprocal error, well inside the bf16 tolerance).
    out_ref[0] = gamma_ref[0, 0] * (mix * inv_l + b0_ref[...]) + x1_q


def _choose_tq(hw, tq):
    if hw % 128 != 0:
        # TODO(synk): for odd spatial sizes, stream key tiles (flash-style)
        # instead of one (hw, hw) score block with masked lane stores.
        return hw
    if tq is not None and tq % 128 == 0 and hw % tq == 0:
        return tq
    if hw % 256 == 0 and hw >= 1024:
        return 256   # fills v6e/v7x's 256-wide MXU and amortizes step overhead
    return 128       # native v5e 128x128 MXU width


def _scoped_vmem_limit(est_bytes):
    """Generation-aware scoped-VMEM request with headroom for Mosaic internals."""
    try:
        cap = pltpu.get_tpu_info().vmem_capacity_bytes
    except Exception:                       # fall back to the tightest budget (v7x)
        cap = 64 * 1024 * 1024
    if est_bytes <= 16 * 1024 * 1024:       # default scoped limit suffices everywhere
        return None
    budget = int(cap * 0.8)                 # ~20% headroom: output buffers, internal scratch
    return max(16 * 1024 * 1024, min(int(est_bytes * 1.25), budget))


def attn_block_pallas(x1_nchw, x2_nchw, params, *, tq=None):
    """x1_nchw: (n, c1, h, w), x2_nchw: (n, c2, h, w). Returns (n, c1, h, w)."""
    n, c1, h, w = x1_nchw.shape
    _, c2, _, _ = x2_nchw.shape
    hw = h * w
    hidden = params["w1"].shape[0]

    # NCHW -> (n, c, hw): pure reshape. Residual/query stream stays f32; the
    # big resident value/key inputs are pre-cast to bf16 (they are only ever
    # consumed as bf16 MXU operands) -> half the DMA bytes and VMEM residency.
    x1_cf = x1_nchw.reshape(n, c1, hw)
    x1_kv = x1_cf.astype(jnp.bfloat16)
    x2_cf = x2_nchw.reshape(n, c2, hw).astype(jnp.bfloat16)

    tq_eff = _choose_tq(hw, tq)
    grid = (n, hw // tq_eff)

    # bf16 conv weights for the MXU. w0 gets an appended zero row so the mix
    # matmul also emits the softmax row-sums (via the e0 "ones-row" bias).
    w0a = jnp.concatenate(
        [params["w0"], jnp.zeros((1, c1), params["w0"].dtype)], axis=0
    ).astype(jnp.bfloat16)
    e0 = jnp.concatenate(
        [jnp.zeros((c1, 1), jnp.float32), jnp.ones((1, 1), jnp.float32)], axis=0)
    w1 = params["w1"].astype(jnp.bfloat16)
    w2 = params["w2"].astype(jnp.bfloat16)

    # VMEM working-set estimate: double-buffered I/O blocks, per-batch caches,
    # the live (tq, hw) score/prob arrays and the q==0 projection temporaries.
    bf, f4 = 2, 4
    est_bytes = (
        2 * 2 * c1 * tq_eff * f4                # x1q input + output blocks, 2x buffers
        + 2 * (c1 + c2) * hw * bf               # resident bf16 x1/x2 blocks, 2x buffers
        + (hidden + c1 + 1) * hw * bf           # per-batch projection caches (scratch)
        + tq_eff * hw * (f4 + f4 + bf)          # s, exp(s), bf16 probs live together
        + (hidden + c1 + 1) * hw * f4           # f32 temporaries of the q==0 projections
        + 3 * (hidden + c1 + 1) * tq_eff * f4   # f1 / mixl / misc small temporaries
    )
    # TODO(synk): for very large h*w, add a key-tile grid axis with an online
    # (flash-style) softmax so the live (tq, hw) block becomes (tq, tk).
    vmem_limit = _scoped_vmem_limit(est_bytes)

    out_cf = pl.pallas_call(
        attn_block_kernel,
        out_shape=jax.ShapeDtypeStruct((n, c1, hw), jnp.float32),
        grid_spec=pltpu.PrefetchScalarGridSpec(
            num_scalar_prefetch=0,
            grid=grid,
            in_specs=[
                pl.BlockSpec((1, c1, tq_eff), lambda b, q: (b, 0, q)),  # x1 query tile (f32)
                pl.BlockSpec((1, c1, hw), lambda b, q: (b, 0, 0)),      # x1 full, values (bf16)
                pl.BlockSpec((1, c2, hw), lambda b, q: (b, 0, 0)),      # x2 full, keys (bf16)
                pl.BlockSpec((c1 + 1, c1), lambda b, q: (0, 0)),        # w0 (zero-row augmented)
                pl.BlockSpec((c1 + 1, 1), lambda b, q: (0, 0)),         # e0 ones-row indicator
                pl.BlockSpec((c1, 1), lambda b, q: (0, 0)),             # b0
                pl.BlockSpec((hidden, c1), lambda b, q: (0, 0)),        # w1
                pl.BlockSpec((hidden, 1), lambda b, q: (0, 0)),         # b1
                pl.BlockSpec((hidden, c2), lambda b, q: (0, 0)),        # w2
                pl.BlockSpec((hidden, 1), lambda b, q: (0, 0)),         # b2
                pl.BlockSpec(memory_space=pltpu.MemorySpace.SMEM),      # gamma scalar
            ],
            out_specs=pl.BlockSpec((1, c1, tq_eff), lambda b, q: (b, 0, q)),
            scratch_shapes=[
                pltpu.VMEM((hidden, hw), jnp.bfloat16),      # f2 (key projection) cache
                pltpu.VMEM((c1 + 1, hw), jnp.bfloat16),      # [x0 ; ones] (value) cache
            ],
        ),
        compiler_params=pltpu.CompilerParams(
            # Batch is the megacore 'parallel' axis; the query axis must stay
            # 'arbitrary' so the per-batch q == 0 cache init is sequenced.
            dimension_semantics=("parallel", "arbitrary"),
            vmem_limit_bytes=vmem_limit,
        ),
    )(x1_cf, x1_kv, x2_cf, w0a, e0, params["b0"], w1, params["b1"], w2,
      params["b2"], params["gamma"])

    # (n, c1, hw) -> NCHW (pure reshape).
    return out_cf.reshape(n, c1, h, w)


def attn_block_reference(x1, x2, params):
    """Plain-JAX f32 reference mirroring the PyTorch forward (NCHW)."""
    n, c, h, w = x1.shape
    hw = h * w

    def conv1x1(x, w_mat, b_vec):  # w_mat: (c_out, c_in), b_vec: (c_out, 1)
        return jnp.einsum('nchw,oc->nohw', x, w_mat) + b_vec[:, 0][None, :, None, None]

    x1_feat = conv1x1(x1, params["w1"], params["b1"]).reshape(n, -1, hw).transpose(0, 2, 1)
    x2_feat = conv1x1(x2, params["w2"], params["b2"]).reshape(n, -1, hw)
    attn = jax.nn.softmax(jnp.einsum('nik,nkj->nij', x1_feat, x2_feat), axis=-1)
    x0_feat = conv1x1(x1, params["w0"], params["b0"]).reshape(n, -1, hw)
    out = jnp.einsum('ncj,nij->nci', x0_feat, attn).reshape(n, c, h, w)
    return params["gamma"][0, 0] * out + x1


if __name__ == "__main__":
    # Small shapes consistent with the module's forward; h*w=256 with tq=128
    # exercises both grid axes and the per-batch (q==0) projection caching.
    n, c1, c2, h, w, hidden = 2, 4, 6, 16, 16, 8

    key = jax.random.PRNGKey(0)
    k = jax.random.split(key, 8)

    x1 = jax.random.normal(k[0], (n, c1, h, w), jnp.float32)
    x2 = jax.random.normal(k[1], (n, c2, h, w), jnp.float32)

    # Deterministic parameter init. Conv weights use torch's (c_out, c_in)
    # layout (kernel_size=1 squeezed); biases are (c_out, 1).
    # NOTE: torch initializes gamma to 0 (output == x1); we use a nonzero
    # gamma so the attention path is actually exercised numerically.
    params = {
        "w0": 0.1 * jax.random.normal(k[2], (c1, c1), jnp.float32),
        "b0": 0.1 * jax.random.normal(k[3], (c1, 1), jnp.float32),
        "w1": 0.1 * jax.random.normal(k[4], (hidden, c1), jnp.float32),
        "b1": 0.1 * jax.random.normal(k[5], (hidden, 1), jnp.float32),
        "w2": 0.1 * jax.random.normal(k[6], (hidden, c2), jnp.float32),
        "b2": 0.1 * jax.random.normal(k[7], (hidden, 1), jnp.float32),
        "gamma": jnp.full((1, 1), 0.5, jnp.float32),
    }

    out = attn_block_pallas(x1, x2, params)
    out = jax.block_until_ready(out)

    ref = attn_block_reference(x1, x2, params)
    assert out.shape == (n, c1, h, w)
    # bf16 MXU operands + deferred approx-reciprocal normalization => compare
    # with a mixed-precision tolerance against the full-f32 reference.
    max_err = float(jnp.max(jnp.abs(out - ref)))
    assert max_err < 2e-2, f"Pallas output mismatch vs reference (max abs err {max_err})"

    print("KERNEL_OK")
</pallas_src>

<mosaic_0001>
module attributes {stable_mosaic.version = 11 : i64} {
  func.func @attn_block_kernel(%arg0: i32, %arg1: i32, %arg2: memref<1x4x128xf32, #tpu.memory_space<vmem>>, %arg3: memref<1x4x256xbf16, #tpu.memory_space<vmem>>, %arg4: memref<1x6x256xbf16, #tpu.memory_space<vmem>>, %arg5: memref<5x4xbf16, #tpu.memory_space<vmem>>, %arg6: memref<5x1xf32, #tpu.memory_space<vmem>>, %arg7: memref<4x1xf32, #tpu.memory_space<vmem>>, %arg8: memref<8x4xbf16, #tpu.memory_space<vmem>>, %arg9: memref<8x1xf32, #tpu.memory_space<vmem>>, %arg10: memref<8x6xbf16, #tpu.memory_space<vmem>>, %arg11: memref<8x1xf32, #tpu.memory_space<vmem>>, %arg12: memref<1x1xf32, #tpu.memory_space<smem>>, %arg13: memref<1x4x128xf32, #tpu.memory_space<vmem>>, %arg14: memref<8x256xbf16, #tpu.memory_space<vmem>>, %arg15: memref<5x256xbf16, #tpu.memory_space<vmem>>) attributes {dimension_semantics = [#tpu.dimension_semantics<parallel>, #tpu.dimension_semantics<arbitrary>], iteration_bounds = array<i64: 2, 2>, scalar_prefetch = 0 : i64, scratch_operands = 2 : i64, tpu.core_type = #tpu.core_type<tc>, window_params = [{transform_indices = @transform_0, window_bounds = array<i64: 1, 4, 128>}, {transform_indices = @transform_1, window_bounds = array<i64: 1, 4, 256>}, {transform_indices = @transform_2, window_bounds = array<i64: 1, 6, 256>}, {pipeline_mode = #tpu.pipeline_mode<synchronous>, transform_indices = @transform_3, window_bounds = array<i64: 5, 4>}, {pipeline_mode = #tpu.pipeline_mode<synchronous>, transform_indices = @transform_4, window_bounds = array<i64: 5, 1>}, {pipeline_mode = #tpu.pipeline_mode<synchronous>, transform_indices = @transform_5, window_bounds = array<i64: 4, 1>}, {pipeline_mode = #tpu.pipeline_mode<synchronous>, transform_indices = @transform_6, window_bounds = array<i64: 8, 4>}, {pipeline_mode = #tpu.pipeline_mode<synchronous>, transform_indices = @transform_7, window_bounds = array<i64: 8, 1>}, {pipeline_mode = #tpu.pipeline_mode<synchronous>, transform_indices = @transform_8, window_bounds = array<i64: 8, 6>}, {pipeline_mode = #tpu.pipeline_mode<synchronous>, transform_indices = @transform_9, window_bounds = array<i64: 8, 1>}, {transform_indices = @transform_10, window_bounds = array<i64: 1, 1>}, {transform_indices = @transform_11, window_bounds = array<i64: 1, 4, 128>}]} {
    %c0_i32 = arith.constant 0 : i32
    %0 = arith.cmpi eq, %arg1, %c0_i32 : i32
    %1 = arith.extui %0 : i1 to i32
    %c0_i32_0 = arith.constant 0 : i32
    %2 = arith.cmpi ne, %1, %c0_i32_0 : i32
    scf.if %2 {
      %c0_21 = arith.constant 0 : index
      %c0_22 = arith.constant 0 : index
      %37 = vector.load %arg10[%c0_21, %c0_22] : memref<8x6xbf16, #tpu.memory_space<vmem>>, vector<8x6xbf16>
      %c0_23 = arith.constant 0 : index
      %c0_24 = arith.constant 0 : index
      %c0_25 = arith.constant 0 : index
      %38 = vector.load %arg4[%c0_23, %c0_24, %c0_25] : memref<1x6x256xbf16, #tpu.memory_space<vmem>>, vector<1x6x256xbf16>
      %39 = vector.shape_cast %38 : vector<1x6x256xbf16> to vector<6x256xbf16>
      %cst_26 = arith.constant dense<0.000000e+00> : vector<8x256xf32>
      %40 = tpu.matmul %37, %39, %cst_26 {dimension_numbers = #tpu.dot_dimension_numbers<[1], [0], [0], [1], [0, 0, 1, 1], [], []>} : vector<8x6xbf16>, vector<6x256xbf16>, vector<8x256xf32> -> vector<8x256xf32>
      %c0_27 = arith.constant 0 : index
      %c0_28 = arith.constant 0 : index
      %41 = vector.load %arg11[%c0_27, %c0_28] : memref<8x1xf32, #tpu.memory_space<vmem>>, vector<8x1xf32>
      %42 = vector.broadcast %41 : vector<8x1xf32> to vector<8x256xf32>
      %43 = arith.addf %40, %42 : vector<8x256xf32>
      %44 = arith.truncf %43 : vector<8x256xf32> to vector<8x256xbf16>
      %c0_29 = arith.constant 0 : index
      %c0_30 = arith.constant 0 : index
      %45 = vector.load %arg14[%c0_29, %c0_30] : memref<8x256xbf16, #tpu.memory_space<vmem>>, vector<8x256xbf16>
      tpu.vector_store %arg14[%c0_29, %c0_30], %44 {strides = array<i32>} : memref<8x256xbf16, #tpu.memory_space<vmem>>, vector<8x256xbf16>,
      %c0_31 = arith.constant 0 : index
      %c0_32 = arith.constant 0 : index
      %46 = vector.load %arg5[%c0_31, %c0_32] : memref<5x4xbf16, #tpu.memory_space<vmem>>, vector<5x4xbf16>
      %c0_33 = arith.constant 0 : index
      %c0_34 = arith.constant 0 : index
      %c0_35 = arith.constant 0 : index
      %47 = vector.load %arg3[%c0_33, %c0_34, %c0_35] : memref<1x4x256xbf16, #tpu.memory_space<vmem>>, vector<1x4x256xbf16>
      %48 = vector.shape_cast %47 : vector<1x4x256xbf16> to vector<4x256xbf16>
      %cst_36 = arith.constant dense<0.000000e+00> : vector<5x256xf32>
      %49 = tpu.matmul %46, %48, %cst_36 {dimension_numbers = #tpu.dot_dimension_numbers<[1], [0], [0], [1], [0, 0, 1, 1], [], []>} : vector<5x4xbf16>, vector<4x256xbf16>, vector<5x256xf32> -> vector<5x256xf32>
      %c0_37 = arith.constant 0 : index
      %c0_38 = arith.constant 0 : index
      %50 = vector.load %arg6[%c0_37, %c0_38] : memref<5x1xf32, #tpu.memory_space<vmem>>, vector<5x1xf32>
      %51 = vector.broadcast %50 : vector<5x1xf32> to vector<5x256xf32>
      %52 = arith.addf %49, %51 : vector<5x256xf32>
      %53 = arith.truncf %52 : vector<5x256xf32> to vector<5x256xbf16>
      %c0_39 = arith.constant 0 : index
      %c0_40 = arith.constant 0 : index
      %54 = vector.load %arg15[%c0_39, %c0_40] : memref<5x256xbf16, #tpu.memory_space<vmem>>, vector<5x256xbf16>
      tpu.vector_store %arg15[%c0_39, %c0_40], %53 {strides = array<i32>} : memref<5x256xbf16, #tpu.memory_space<vmem>>, vector<5x256xbf16>,
    } else {
    }
    %c0 = arith.constant 0 : index
    %c0_1 = arith.constant 0 : index
    %c0_2 = arith.constant 0 : index
    %3 = vector.load %arg2[%c0, %c0_1, %c0_2] : memref<1x4x128xf32, #tpu.memory_space<vmem>>, vector<1x4x128xf32>
    %4 = vector.shape_cast %3 : vector<1x4x128xf32> to vector<4x128xf32>
    %c0_3 = arith.constant 0 : index
    %c0_4 = arith.constant 0 : index
    %5 = vector.load %arg8[%c0_3, %c0_4] : memref<8x4xbf16, #tpu.memory_space<vmem>>, vector<8x4xbf16>
    %6 = arith.truncf %4 : vector<4x128xf32> to vector<4x128xbf16>
    %cst = arith.constant dense<0.000000e+00> : vector<8x128xf32>
    %7 = tpu.matmul %5, %6, %cst {dimension_numbers = #tpu.dot_dimension_numbers<[1], [0], [0], [1], [0, 0, 1, 1], [], []>} : vector<8x4xbf16>, vector<4x128xbf16>, vector<8x128xf32> -> vector<8x128xf32>
    %c0_5 = arith.constant 0 : index
    %c0_6 = arith.constant 0 : index
    %8 = vector.load %arg9[%c0_5, %c0_6] : memref<8x1xf32, #tpu.memory_space<vmem>>, vector<8x1xf32>
    %9 = vector.broadcast %8 : vector<8x1xf32> to vector<8x128xf32>
    %10 = arith.addf %7, %9 : vector<8x128xf32>
    %11 = arith.truncf %10 : vector<8x128xf32> to vector<8x128xbf16>
    %c0_7 = arith.constant 0 : index
    %c0_8 = arith.constant 0 : index
    %12 = vector.load %arg14[%c0_7, %c0_8] : memref<8x256xbf16, #tpu.memory_space<vmem>>, vector<8x256xbf16>
    %cst_9 = arith.constant dense<0.000000e+00> : vector<128x256xf32>
    %13 = tpu.matmul %11, %12, %cst_9 {dimension_numbers = #tpu.dot_dimension_numbers<[0], [0], [1], [1], [0, 1, 1, 1], [], []>} : vector<8x128xbf16>, vector<8x256xbf16>, vector<128x256xf32> -> vector<128x256xf32>
    %cst_10 = arith.constant dense<0xFF800000> : vector<128xf32>
    %14 = vector.multi_reduction <maximumf>, %13, %cst_10 [1] : vector<128x256xf32> to vector<128xf32>
    %15 = vector.shape_cast %14 : vector<128xf32> to vector<128x1xf32>
    %16 = vector.broadcast %15 : vector<128x1xf32> to vector<128x256xf32>
    %17 = arith.subf %13, %16 : vector<128x256xf32>
    %18 = math.exp %17 : vector<128x256xf32>
    %19 = arith.truncf %18 : vector<128x256xf32> to vector<128x256xbf16>
    %c0_11 = arith.constant 0 : index
    %c0_12 = arith.constant 0 : index
    %20 = vector.load %arg15[%c0_11, %c0_12] : memref<5x256xbf16, #tpu.memory_space<vmem>>, vector<5x256xbf16>
    %cst_13 = arith.constant dense<0.000000e+00> : vector<5x128xf32>
    %21 = tpu.matmul %20, %19, %cst_13 {dimension_numbers = #tpu.dot_dimension_numbers<[1], [1], [0], [0], [0, 0, 1, 0], [], []>} : vector<5x256xbf16>, vector<128x256xbf16>, vector<5x128xf32> -> vector<5x128xf32>
    %22 = vector.extract_strided_slice %21 {offsets = [0, 0], sizes = [4, 128], strides = [1, 1]} : vector<5x128xf32> to vector<4x128xf32>
    %23 = vector.extract_strided_slice %21 {offsets = [4, 0], sizes = [1, 128], strides = [1, 1]} : vector<5x128xf32> to vector<1x128xf32>
    %24 = tpu.reciprocal %23 {approx = true} : vector<1x128xf32> -> vector<1x128xf32>
    %c0_14 = arith.constant 0 : index
    %c0_15 = arith.constant 0 : index
    %25 = memref.load %arg12[%c0_14, %c0_15] : memref<1x1xf32, #tpu.memory_space<smem>>
    %26 = vector.broadcast %24 : vector<1x128xf32> to vector<4x128xf32>
    %27 = arith.mulf %22, %26 : vector<4x128xf32>
    %c0_16 = arith.constant 0 : index
    %c0_17 = arith.constant 0 : index
    %28 = vector.load %arg7[%c0_16, %c0_17] : memref<4x1xf32, #tpu.memory_space<vmem>>, vector<4x1xf32>
    %29 = vector.broadcast %28 : vector<4x1xf32> to vector<4x128xf32>
    %30 = arith.addf %27, %29 : vector<4x128xf32>
    %31 = vector.broadcast %25 : f32 to vector<4x128xf32>
    %32 = arith.mulf %31, %30 : vector<4x128xf32>
    %33 = arith.addf %32, %4 : vector<4x128xf32>
    %c0_18 = arith.constant 0 : index
    %c0_19 = arith.constant 0 : index
    %c0_20 = arith.constant 0 : index
    %34 = vector.load %arg13[%c0_18, %c0_19, %c0_20] : memref<1x4x128xf32, #tpu.memory_space<vmem>>, vector<1x4x128xf32>
    %35 = vector.shape_cast %34 : vector<1x4x128xf32> to vector<4x128xf32>
    %36 = vector.shape_cast %33 : vector<4x128xf32> to vector<1x4x128xf32>
    tpu.vector_store %arg13[%c0_18, %c0_19, %c0_20], %36 {strides = array<i32>} : memref<1x4x128xf32, #tpu.memory_space<vmem>>, vector<1x4x128xf32>,
    return
  }
  func.func @transform_0(%arg0: i32, %arg1: i32) -> (i32, i32, i32) {
    %c0_i32 = arith.constant 0 : i32
    %c0_i32_0 = arith.constant 0 : i32
    return %arg0, %c0_i32, %arg1 : i32, i32, i32
  }
  func.func @transform_1(%arg0: i32, %arg1: i32) -> (i32, i32, i32) {
    %c0_i32 = arith.constant 0 : i32
    %c0_i32_0 = arith.constant 0 : i32
    %c0_i32_1 = arith.constant 0 : i32
    return %arg0, %c0_i32, %c0_i32_0 : i32, i32, i32
  }
  func.func @transform_2(%arg0: i32, %arg1: i32) -> (i32, i32, i32) {
    %c0_i32 = arith.constant 0 : i32
    %c0_i32_0 = arith.constant 0 : i32
    %c0_i32_1 = arith.constant 0 : i32
    return %arg0, %c0_i32, %c0_i32_0 : i32, i32, i32
  }
  func.func @transform_3(%arg0: i32, %arg1: i32) -> (i32, i32) {
    %c0_i32 = arith.constant 0 : i32
    %c0_i32_0 = arith.constant 0 : i32
    %c0_i32_1 = arith.constant 0 : i32
    return %c0_i32, %c0_i32_0 : i32, i32
  }
  func.func @transform_4(%arg0: i32, %arg1: i32) -> (i32, i32) {
    %c0_i32 = arith.constant 0 : i32
    %c0_i32_0 = arith.constant 0 : i32
    %c0_i32_1 = arith.constant 0 : i32
    return %c0_i32, %c0_i32_0 : i32, i32
  }
  func.func @transform_5(%arg0: i32, %arg1: i32) -> (i32, i32) {
    %c0_i32 = arith.constant 0 : i32
    %c0_i32_0 = arith.constant 0 : i32
    %c0_i32_1 = arith.constant 0 : i32
    return %c0_i32, %c0_i32_0 : i32, i32
  }
  func.func @transform_6(%arg0: i32, %arg1: i32) -> (i32, i32) {
    %c0_i32 = arith.constant 0 : i32
    %c0_i32_0 = arith.constant 0 : i32
    %c0_i32_1 = arith.constant 0 : i32
    return %c0_i32, %c0_i32_0 : i32, i32
  }
  func.func @transform_7(%arg0: i32, %arg1: i32) -> (i32, i32) {
    %c0_i32 = arith.constant 0 : i32
    %c0_i32_0 = arith.constant 0 : i32
    %c0_i32_1 = arith.constant 0 : i32
    return %c0_i32, %c0_i32_0 : i32, i32
  }
  func.func @transform_8(%arg0: i32, %arg1: i32) -> (i32, i32) {
    %c0_i32 = arith.constant 0 : i32
    %c0_i32_0 = arith.constant 0 : i32
    %c0_i32_1 = arith.constant 0 : i32
    return %c0_i32, %c0_i32_0 : i32, i32
  }
  func.func @transform_9(%arg0: i32, %arg1: i32) -> (i32, i32) {
    %c0_i32 = arith.constant 0 : i32
    %c0_i32_0 = arith.constant 0 : i32
    %c0_i32_1 = arith.constant 0 : i32
    return %c0_i32, %c0_i32_0 : i32, i32
  }
  func.func @transform_10(%arg0: i32, %arg1: i32) -> (i32, i32) {
    %c0_i32 = arith.constant 0 : i32
    %c0_i32_0 = arith.constant 0 : i32
    %c0_i32_1 = arith.constant 0 : i32
    return %c0_i32, %c0_i32_0 : i32, i32
  }
  func.func @transform_11(%arg0: i32, %arg1: i32) -> (i32, i32, i32) {
    %c0_i32 = arith.constant 0 : i32
    %c0_i32_0 = arith.constant 0 : i32
    return %arg0, %c0_i32, %arg1 : i32, i32, i32
  }
}

</mosaic_0001>

<bundles_post_ra>
// kernel: tpu_custom_call.1
= control target key start
LH: loop header
LB: loop body
LE: loop exit
PB: predicated region body
PF: predicated region fallthrough
CT: control target
= control target key end

     0   :  { %s1714_s0 = inlined_call_operand.vmem [shape: f32[2,4,256], index: 0, kind: input, shape index: {}]   ;;  %s1715_s1 = inlined_call_operand.vmem [shape: bf16[2,4,256], index: 1, kind: input, shape index: {}]   ;;  %s1716_s2 = inlined_call_operand.vmem [shape: bf16[2,6,256], index: 2, kind: input, shape index: {}]   ;;  %s1717_s3 = inlined_call_operand.vmem [shape: bf16[5,4], index: 3, kind: input, shape index: {}]   ;;  %s1718_s4 = inlined_call_operand.vmem [shape: f32[5,1], index: 4, kind: input, shape index: {}]   ;;  %s1719_s5 = inlined_call_operand.vmem [shape: f32[4,1], index: 5, kind: input, shape index: {}]   ;;  %s1720_s6 = inlined_call_operand.vmem [shape: bf16[8,4], index: 6, kind: input, shape index: {}]   ;;  %s1721_s7 = inlined_call_operand.vmem [shape: f32[8,1], index: 7, kind: input, shape index: {}]   ;;  %s1722_s8 = inlined_call_operand.vmem [shape: bf16[8,6], index: 8, kind: input, shape index: {}]   ;;  %s1723_s9 = inlined_call_operand.vmem [shape: f32[8,1], index: 9, kind: input, shape index: {}]   ;;  %s1724_s10 = inlined_call_operand.<no memory space> [shape: f32[1,1], index: 10, kind: input, shape index: {}]   ;;  %s1725_s11 = inlined_call_operand.hbm [shape: f32[2,4,256], index: 11, kind: output, shape index: {}]  }
   0x1   :  { %1739 = sst [smem:[#allocation18_spill]] %s1725_s11 }
   0x2   :  { %16 = sst [smem:[#allocation4]] %s1724_s10 }
   0x3   :  { %17 = vsyncpa [#allocation6], 0 }
   0x4   :  { %19 = vsyncpa [#allocation6 + $0x1], 0  ;;  %s1422_s19 = smov 0   ;;  %s1424_s20 = smov 0  }
   0x5   :  { %s1426_s21 = smov 0   ;;  %s1428_s22 = smov 0  }
   0x6   :  { %s1430_s23 = smov 0   ;;  %s1432_s24 = smov 0  }
   0x7   :  { %s1434_s25 = smov 0   ;;  %s1436_s26 = smov 0  }
   0x8 LB: > { %1740 = sst [smem:[#allocation8_spill]] %s1327_s19  ;;  %s1078_s10 = sadd.s32 4294967295, %s1355_s26   ;;  %s1355_s26 = sphi %s1436_s26, %s25_s26   ;;  %s1351_s25 = sphi %s1434_s25, %s1767_s25   ;;  %s1347_s24 = sphi %s1432_s24, %s1763_s24   ;;  %s1343_s23 = sphi %s1430_s23, %s1762_s23   ;;  %s1339_s22 = sphi %s1428_s22, %s1761_s22   ;;  %s1335_s21 = sphi %s1426_s21, %s1760_s21   ;;  %s1331_s20 = sphi %s1424_s20, %s1766_s20   ;;  %s1327_s19 = sphi %s1422_s19, %s1765_s19  }
   0x9   : > { %1741 = sst [smem:[#allocation9_spill]] %s1335_s21  ;;  %s1079_s27 = sadd.s32 4294967294, %s1355_s26  }
   0xa   : > { %1742 = sst [smem:[#allocation10_spill]] %s1347_s24  ;;  %s34_s28 = sadd.s32 1, %s1347_s24 }
   0xb   : > { %1743 = sst [smem:[#allocation11_spill]] %s1351_s25  ;;  %p35_p0 = scmp.ge.s32.totalorder %s34_s28, 2 }
   0xc   : > { %1744 = sst [smem:[#allocation12_spill]] %s1355_s26  ;;  %s37_s29 = sadd.s32 1, %s1351_s25 }
   0xd   : > { %p304_p1 = scmp.ne.s32.totalorder %s1335_s21, %s1331_s20  ;;  %p305_p2 = scmp.eq.s32.totalorder %s1078_s10, 3 }
   0xe   : > { %s1769_s28 = smov (%p35_p0, %s34_s28), 0  ;;  %s1771_s29 = smov (!%p35_p0, %s37_s29), %s1351_s25 }
   0xf   : > { %1745 = sst [smem:[#allocation13_spill]] %s1769_s28  ;;  %s290_s30 = ssub.s32 %s1347_s24, %s1769_s28 }
  0x10   : > { %p1473_p3 = por %p305_p2, %p304_p1  ;;  %p39_p4 = scmp.ge.s32.totalorder %s1771_s29, 2 }
  0x11   : > { %p310_p5 = scmp.ne.s32.totalorder %s1331_s20, %s1327_s19  ;;  %p311_p6 = scmp.eq.s32.totalorder %s1079_s27, 3 }
  0x12   : > { %s1746_s12 = scalar_select %p1473_p3, 1, 0 }
  0x13   : > { %p1082_p7 = scmp.ge.s32.totalorder %s1355_s26, 1  ;;  %s1773_s29 = smov (%p39_p4, %s1771_s29), 0 }
  0x14   : > { %1747 = sst [smem:[#allocation14_spill]] %s1746_s12  ;;  %p1482_p8 = por %p311_p6, %p310_p5 }
  0x15   : > { %1748 = sst [smem:[#allocation15_spill]] %s1773_s29  ;;  %p380_p9 = scmp.lt.s32.totalorder %s1355_s26, 5 }
  0x16   : > { %s1749_s13 = scalar_select %p1482_p8, 1, 0 }
  0x17   : > { %s289_s14 = ssub.s32 %s1351_s25, %s1773_s29  ;;  %s294_s15 = sadd.s32 1, %s1335_s21 }
  0x18   : > { %1750 = sst [smem:[#allocation16_spill]] %s1749_s13  ;;  %s291_s16 = sor.u32 %s290_s30, %s289_s14 }
  0x19   : > { %p381_p10 = pnand %p1082_p7, %p380_p9  ;;  %p292_p11 = scmp.eq.s32.totalorder %s291_s16, 0 }
  0x1a   : > { %s1733_s18 = sand.u32 (!%p381_p10), 1, %s1331_s20   ;;  %p433_p12 = scmp.lt.s32.totalorder (!%p381_p10), %s1343_s23, 1 }
  0x1b   : > { %s1491_s17 = scalar_select %p292_p11, %s1335_s21, %s294_s15  }
  0x1c   : > { %384 = sbr.rel (%p381_p10) target bundleno = 1108 (0x454), region = 64  ;;  %s1497_s10 = sshll.u32 (!%p381_p10), %s1733_s18, 2 }
  0x1d   : > { %1751 = sst [smem:[#allocation17_spill]] %s1491_s17  ;;  %p435_p13 = scmp.lt.s32.totalorder (!%p381_p10), %s1339_s22, 1 }
  0x1e   : > { %s432_s11 = scalar_lea.vmem (!%p381_p10), [#allocation5], %s1497_s10  ;;  %p1090_p0 = scmp.ne.s32.totalorder (!%p381_p10), %s1339_s22, 0 }
  0x21   : > { %s434_s27 = scalar_select %p433_p12, %s1343_s23, 1 }
  0x22   : > { %s436_s30 = scalar_select %p435_p13, %s1339_s22, 1 }
  0x23   : > { %s1084_s14 = sshll.u32 %s434_s27, 1  ;;  %s1117_s16 = sshll.u32 %s434_s27, 2 }
  0x24   : > { %s438_s15 = sadd.s32 %s1084_s14, %s436_s30  ;;  %s445_s25 = scalar_lea.vmem %s1715_s1, %s1117_s16 }
  0x25   : > { %s1085_s24 = sshll.u32 %s438_s15, 2  ;;  %s1118_s17 = sshll.u32 %s434_s27, 3 }
  0x26   : > { %s1508_s19 = scalar_lea.vmem %s1714_s0, %s1085_s24  ;;  %s450_s12 = scalar_lea.vmem %s1716_s2, %s1118_s17 }
  0x27   : > { %455 = sbr.rel (%p1090_p0) target bundleno = 198 (0xc6), region = 68 }
  0x2c   : > { %v457_v0 = vld [vmem:[%s450_s12] sm:$0x77]  ;;  %vm473_vm0 = vcmask 1042432   ;;  %v1357_v7 = vmov 0   ;;  %vm469_vm1 = vcmask 48128   ;;  %vm524_vm2 = vcmask 1041408  }
  0x2d   : > { %v465_v1 = vunpack.c.l.b16 %v457_v0  ;;  %v466_v2 = vunpack.c.h.b16 %v457_v0  ;;  %v509_v3 = vld [vmem:[%s445_s25] sm:$0xf]  ;;  %1192 = vset.pattern.permute.xlu0 %v1357_v7  ;;  %vm520_vm3 = vcmask 31744   ;;  %vm557_vm4 = vsmask.f32 2304 }
  0x2e   : > { %517 = vst [vmem:[#allocation1] ss:$4 sm:$0xff] %v509_v3  ;;  %v510_v6 = vld [vmem:[%s1718_s4] sm:$0x1f]  ;;  %vm559_vm5 = vcmask 1046532   ;;  %vm558_vm7 = vmand %vm473_vm0, %vm557_vm4 }
  0x2f   : > { %v467_v4 = vpack.c.b16 %v465_v1, %v465_v1  ;;  %v468_v5 = vpack.c.b16 %v466_v2, %v466_v2  ;;  %513 = vperm.xlu0 %1192, %v510_v6   ;;  %v456_v10 = vld [vmem:[%s1722_s8] sm:$0xf]  ;;  %vm560_vm6 = vsmask.f32 6400  ;;  %v563_v30 = vld [vmem:[#allocation3] sm:$0x77] }
  0x30   : > { %v458_v15 = vld [vmem:[%s1723_s9] sm:$0xff]  ;;  %vm561_vm8 = vmand %vm559_vm5, %vm560_vm6 }
  0x31   : > { %v475_v8 = vsel %vm473_vm0, %v467_v4, 0  ;;  %v478_v9 = vsel %vm473_vm0, %v468_v5, 0  ;;  %v508_v16 = vld [vmem:[%s1717_s3] sm:$0x7]  ;;  %vm562_vm9 = vmor %vm561_vm8, %vm558_vm7 }
  0x32   : > { %487 = vmatpush.bf16.msra.mxu0 %v475_v8  ;;  %500 = vmatpush.bf16.msra.mxu1 %v478_v9 }
  0x35   : > { %v518_v11 = vld.sshfl [vmem:[#allocation1] sm:$0xff pattern:$0x73625140]  ;;  %v519_v12 = vld.sshfl [vmem:[#allocation1 + $0x8] sm:$0xff pattern:$0x73625140]  ;;  %1091 = vmatmul.msk.bf16.vlgmr.msra.gmra.mxu0 %vm469_vm1, %v456_v10  ;;  %1092 = vmatmul.msk.bf16.vlgmr.msra.gmra.mxu1 %vm469_vm1, %v456_v10 }
  0x36   : > { %v525_v13 = vsel %vm524_vm2, %v518_v11, 0  ;;  %v527_v14 = vsel %vm524_vm2, %v519_v12, 0 }
  0x37   : > { %536 = vmatpush.bf16.msra.mxu2 %v525_v13  ;;  %549 = vmatpush.bf16.msra.mxu3 %v527_v14 }
  0x38   : > { %461 = vperm.xlu0 %1192, %v458_v15  }
  0x3a   : > { %1093 = vmatmul.msk.bf16.vlgmr.msra.gmra.mxu2 %vm520_vm3, %v508_v16  ;;  %1094 = vmatmul.msk.bf16.vlgmr.msra.gmra.mxu3 %vm520_vm3, %v508_v16 }
  0xa1   : > { %v514_v17 = vpop.permute.xlu0 %513 }
  0xaa   : > { %v462_v18 = vpop.permute.xlu0 %461 }
  0xb2   : > { %v489_v19 = vpop.f32.mrf.mxu0  ;;  %v502_v20 = vpop.f32.mrf.mxu1 }
  0xb3   : > { %v490_v21 = vadd.f32 %v489_v19, %v462_v18  ;;  %v503_v22 = vadd.f32 %v502_v20, %v462_v18 }
  0xb5   : > { %v506_v23 = vpack.c.bf16 %v503_v22, %v490_v21 }
  0xb7   : > { %507 = vst [vmem:[#allocation2] sm:$0xff] %v506_v23 }
  0xba   : > { %v491_v24 = vpop.f32.mrf.mxu0  ;;  %v504_v25 = vpop.f32.mrf.mxu1 }
  0xbd   : > { %v538_v26 = vpop.f32.mrf.mxu2  ;;  %v551_v27 = vpop.f32.mrf.mxu3 }
  0xbe   : > { %v539_v28 = vadd.f32 %v538_v26, %v514_v17  ;;  %v552_v29 = vadd.f32 %v551_v27, %v514_v17 }
  0xc0   : > { %v555_v31 = vpack.c.bf16 %v552_v29, %v539_v28 }
  0xc2   : > { %v564_v32 = vsel %vm562_vm9, %v555_v31, %v563_v30 }
  0xc3   : > { %565 = vst [vmem:[#allocation3] sm:$0x77] %v564_v32 }
  0xc5   : > { %v540_v33 = vpop.f32.mrf.mxu2  ;;  %v553_v34 = vpop.f32.mrf.mxu3 }
  0xc6 PF: > { %v1531_v35 = vld [vmem:[%s1508_s19] sm:$0xf]  ;;  %vm579_vm10 = vcmask 1041408   ;;  %v1358_v38 = vmov 0   ;;  %vm575_vm11 = vcmask 31744   ;;  %v597_v41 = vld [vmem:[#allocation2] sm:$0xff] }
  0xc7   : > { %v568_v36 = vpack.c.bf16 %v1531_v35, %v1531_v35  ;;  %v569_v37 = vld [vmem:[%s1721_s7] sm:$0xff]  ;;  %1193 = vset.pattern.permute.xlu0 %v1358_v38  ;;  %1194 = vset.pattern.permute.xlu2 %v1358_v38  ;;  %v615_v42 = vunpack.c.l.b16 %v597_v41  ;;  %v616_v43 = vunpack.c.h.b16 %v597_v41  ;;  %vm644_vm12 = vcmask 1043456   ;;  %s1113_s16 = sshll.u32 %s1343_s23, 1  ;;  %s944_s15 = sld [smem:[#allocation4]] }
  0xc8   : > { %572 = vperm.xlu0 %1193, %v569_v37   ;;  %v567_v40 = vld [vmem:[%s1720_s6] sm:$0xf]  ;;  %vm619_vm13 = vcmask 64512   ;;  %s969_s28 = sadd.s32 %s1339_s22, %s1113_s16  ;;  %s1752_s25 = sld [smem:[#allocation18_spill]] }
  0xc9   : > { %v581_v39 = vsel %vm579_vm10, %v568_v36, 0  ;;  %v617_v44 = vpack.c.b16 %v615_v42, %v615_v42  ;;  %v618_v45 = vpack.c.b16 %v616_v43, %v616_v43  ;;  %s1114_s21 = sshll.u32 %s969_s28, 2  ;;  %s973_s17 = sshll.u32 %s432_s11, 4  ;;  %s974_s17 = int_to_ptr.vmem [resolvable:$true] %s973_s17 }
  0xca   : > { %590 = vmatpush.bf16.msra.mxu0 %v581_v39  ;;  %s1755_s22 = sand.u32 1, %s1331_s20  }
  0xcb   : > { %v646_v46 = vsel %vm644_vm12, %v617_v44, 0  ;;  %v649_v47 = vsel %vm644_vm12, %v618_v45, 0  ;;  %s959_s18 = scalar_lea.sflag [#allocation6], %s1755_s22 }
  0xcc   : > { %658 = vmatpush.bf16.msra.mxu1 %v646_v46  ;;  %707 = vmatpush.bf16.msra.mxu2 %v649_v47 }
  0xcd   : > { %1095 = vmatmul.msk.bf16.vlgmr.msra.gmra.mxu0 %vm575_vm11, %v567_v40 }
  0xce   : > { %s1753_s29 = smov %s1752_s25  ;;  %s971_s13 = scalar_lea.hbm %s1752_s25, %s1114_s21 }
  0xcf   : > { %s975_s23 = sshll.u32 %s971_s13, 4  ;;  %s1281_s16 = scalar_lea.hbm %s1753_s29, 16  ;;  %s976_s23 = int_to_ptr.hbm [resolvable:$true] %s975_s23 }
  0xd0   : > { %s1275_s27 = sshra.s32 %s976_s23, 4  ;;  %s1276_s27 = int_to_ptr.hbm [resolvable:$true] %s1275_s27 }
  0xd1   : > { %s1277_s30 = scalar_lea.hbm %s1276_s27, 4  ;;  %p1282_p5 = scmp.lt.s32.totalorder %s1276_s27, %s1753_s29 }
  0xd2   : > { %p1278_p1 = scmp.ne.s32.totalorder %s1276_s27, %s1277_s30  ;;  %p1283_p6 = scmp.lt.s32.totalorder %s1281_s16, %s1277_s30 }
  0xd4   : > { %p1279_p2 = pnand %p1278_p1, %p1473_p3  ;;  %p1284_p7 = por %p1283_p6, %p1282_p5 }
  0xd6   : > { %p1280_p4 = pneg %p1279_p2 }
  0xd8   : > { %p1285_p9 = pnand %p1284_p7, %p1280_p4 }
 0x13a   : > { %v573_v48 = vpop.permute.xlu0 %572 }
 0x14a   : > { %v592_v49 = vpop.f32.mrf.mxu0 }
 0x14b   : > { %v593_v50 = vadd.f32 %v592_v49, %v573_v48 }
 0x14d   : > { %v596_v51 = vpack.c.bf16 %v593_v50, %v593_v50 }
 0x14f   : > { %598 = vxpose.xlu0.c.b16.start.end [1/1] (short) %v596_v51, 128 }
 0x152   : > { %v594_v52 = vpop.f32.mrf.mxu0 }
 0x1fb   : > { %v606_v53 = vpop.trf.xlu0 }
 0x1fc   : > { %1096 = vmatmul.msk.bf16.vlgmr.msra.gmra.mxu1 %vm619_vm13, %v606_v53  ;;  %1104 = vmatmul.msk.bf16.vlgmr.msra.gmra.mxu2 %vm619_vm13, %v606_v53 }
 0x20b   : > { %v607_v54 = vpop.trf.xlu0 }
 0x20c   : > { %1097 = vmatmul.msk.bf16.gmra.mxu1 %vm619_vm13, %v607_v54  ;;  %1105 = vmatmul.msk.bf16.gmra.mxu2 %vm619_vm13, %v607_v54 }
 0x21b   : > { %v608_v55 = vpop.trf.xlu0 }
 0x21c   : > { %1098 = vmatmul.msk.bf16.gmra.mxu1 %vm619_vm13, %v608_v55  ;;  %1106 = vmatmul.msk.bf16.gmra.mxu2 %vm619_vm13, %v608_v55 }
 0x22b   : > { %v609_v56 = vpop.trf.xlu0 }
 0x22c   : > { %1099 = vmatmul.msk.bf16.gmra.mxu1 %vm619_vm13, %v609_v56  ;;  %1107 = vmatmul.msk.bf16.gmra.mxu2 %vm619_vm13, %v609_v56 }
 0x23b   : > { %v610_v57 = vpop.trf.xlu0 }
 0x23c   : > { %1100 = vmatmul.msk.bf16.gmra.mxu1 %vm619_vm13, %v610_v57  ;;  %1108 = vmatmul.msk.bf16.gmra.mxu2 %vm619_vm13, %v610_v57 }
 0x24b   : > { %v611_v58 = vpop.trf.xlu0 }
 0x24c   : > { %1101 = vmatmul.msk.bf16.gmra.mxu1 %vm619_vm13, %v611_v58  ;;  %1109 = vmatmul.msk.bf16.gmra.mxu2 %vm619_vm13, %v611_v58 }
 0x25b   : > { %v612_v59 = vpop.trf.xlu0 }
 0x25c   : > { %1102 = vmatmul.msk.bf16.gmra.mxu1 %vm619_vm13, %v612_v59  ;;  %1110 = vmatmul.msk.bf16.gmra.mxu2 %vm619_vm13, %v612_v59 }
 0x26b   : > { %v613_v60 = vpop.trf.xlu0 }
 0x26c   : > { %1103 = vmatmul.msk.bf16.gmra.mxu1 %vm619_vm13, %v613_v60  ;;  %1111 = vmatmul.msk.bf16.gmra.mxu2 %vm619_vm13, %v613_v60 }
 0x279   : > { %v1557_v61 = vpop.f32.mrf.mxu1 }
 0x27f   : > { %v1559_v62 = vpop.f32.mrf.mxu2 }
 0x280   : > { %v749_v41 = vmax.f32 %v1557_v61, %v1559_v62 }
 0x281   : > { %v1561_v63 = vpop.f32.mrf.mxu1 }
 0x287   : > { %v1563_v0 = vpop.f32.mrf.mxu2 }
 0x288   : > { %v752_v45 = vmax.f32 %v1561_v63, %v1563_v0 }
 0x289   : > { %v1565_v1 = vpop.f32.mrf.mxu1 }
 0x28f   : > { %v1567_v2 = vpop.f32.mrf.mxu2 }
 0x290   : > { %v755_v3 = vmax.f32 %v1565_v1, %v1567_v2 }
 0x291   : > { %v1571_v4 = vpop.f32.mrf.mxu1 }
 0x292   : > { %756 = vmax.xlane.f32.xlu0 %v755_v3 }
 0x297   : > { %v1573_v5 = vpop.f32.mrf.mxu2 }
 0x298   : > { %v758_v44 = vmax.f32 %v1571_v4, %v1573_v5 }
 0x299   : > { %v1575_v6 = vpop.f32.mrf.mxu1 }
 0x29f   : > { %v1577_v7 = vpop.f32.mrf.mxu2 }
 0x2a0   : > { %v761_v43 = vmax.f32 %v1575_v6, %v1577_v7 }
 0x2a1   : > { %v1579_v8 = vpop.f32.mrf.mxu1 }
 0x2a7   : > { %v1581_v9 = vpop.f32.mrf.mxu2 }
 0x2a8   : > { %v764_v39 = vmax.f32 %v1579_v8, %v1581_v9 }
 0x2a9   : > { %v1583_v10 = vpop.f32.mrf.mxu1 }
 0x2af   : > { %v1585_v11 = vpop.f32.mrf.mxu2 }
 0x2b0   : > { %v767_v42 = vmax.f32 %v1583_v10, %v1585_v11 }
 0x2b1   : > { %v1587_v12 = vpop.f32.mrf.mxu1 }
 0x2b7   : > { %v1589_v13 = vpop.f32.mrf.mxu2 }
 0x2b8   : > { %v770_v37 = vmax.f32 %v1587_v12, %v1589_v13 }
 0x2b9   : > { %v1591_v14 = vpop.f32.mrf.mxu1 }
 0x2bf   : > { %v1593_v15 = vpop.f32.mrf.mxu2 }
 0x2c0   : > { %v773_v40 = vmax.f32 %v1591_v14, %v1593_v15 }
 0x2c1   : > { %v1595_v16 = vpop.f32.mrf.mxu1 }
 0x2c7   : > { %v1597_v17 = vpop.f32.mrf.mxu2 }
 0x2c8   : > { %v776_v36 = vmax.f32 %v1595_v16, %v1597_v17 }
 0x2c9   : > { %v1599_v18 = vpop.f32.mrf.mxu1 }
 0x2cf   : > { %v1601_v19 = vpop.f32.mrf.mxu2 }
 0x2d0   : > { %v779_v38 = vmax.f32 %v1599_v18, %v1601_v19 }
 0x2d1   : > { %v1603_v20 = vpop.f32.mrf.mxu1 }
 0x2d7   : > { %v1605_v21 = vpop.f32.mrf.mxu2 }
 0x2d8   : > { %v782_v30 = vmax.f32 %v1603_v20, %v1605_v21 }
 0x2d9   : > { %v1607_v22 = vpop.f32.mrf.mxu1 }
 0x2df   : > { %v1609_v23 = vpop.f32.mrf.mxu2 }
 0x2e0   : > { %v785_v24 = vmax.f32 %v1607_v22, %v1609_v23 }
 0x2e1   : > { %v692_v25 = vpop.f32.mrf.mxu1 }
 0x2e2   : > { %786 = vmax.xlane.f32.xlu2 %v785_v24 }
 0x2e7   : > { %v741_v26 = vpop.f32.mrf.mxu2 }
 0x2e8   : > { %v788_v27 = vmax.f32 %v692_v25, %v741_v26 }
 0x2e9   : > { %v695_v28 = vpop.f32.mrf.mxu1 }
 0x2ea   : > { %789 = vmax.xlane.f32.xlu2 %v788_v27 }
 0x2ef   : > { %v744_v29 = vpop.f32.mrf.mxu2 }
 0x2f0   : > { %v791_v31 = vmax.f32 %v695_v28, %v744_v29 }
 0x2f1   : > { %v697_v32 = vpop.f32.mrf.mxu1 }
 0x2f2   : > { %783 = vmax.xlane.f32.xlu2 %v782_v30  ;;  %792 = vmax.xlane.f32.xlu1 %v791_v31 }
 0x2f7   : > { %v746_v33 = vpop.f32.mrf.mxu2 }
 0x2f8   : > { %v794_v34 = vmax.f32 %v697_v32, %v746_v33 }
 0x2fa   : > { %777 = vmax.xlane.f32.xlu2 %v776_v36  ;;  %795 = vmax.xlane.f32.xlu1 %v794_v34 }
 0x302   : > { %771 = vmax.xlane.f32.xlu2 %v770_v37  ;;  %780 = vmax.xlane.f32.xlu1 %v779_v38 }
 0x30a   : > { %765 = vmax.xlane.f32.xlu2 %v764_v39  ;;  %774 = vmax.xlane.f32.xlu1 %v773_v40 }
 0x312   : > { %750 = vmax.xlane.f32.xlu2 %v749_v41  ;;  %768 = vmax.xlane.f32.xlu1 %v767_v42 }
 0x31a   : > { %762 = vmax.xlane.f32.xlu1 %v761_v43 }
 0x322   : > { %759 = vmax.xlane.f32.xlu1 %v758_v44 }
 0x32a   : > { %753 = vmax.xlane.f32.xlu1 %v752_v45 }
 0x355   : > { %v787_v46 = vpop.xlane.xlu2 %786 }
 0x356   : > { %v821_v3 = vsub.f32 %v1607_v22, %v787_v46  ;;  %v822_v24 = vsub.f32 %v1609_v23, %v787_v46 }
 0x358   : > { %v877_v31 = vmul.f32 1.442695, %v821_v3 }
 0x35d   : > { %v790_v48 = vpop.xlane.xlu2 %789 }
 0x35e   : > { %v823_v58 = vsub.f32 %v692_v25, %v790_v48  ;;  %v824_v59 = vsub.f32 %v741_v26, %v790_v48 }
 0x365   : > { %v793_v47 = vpop.xlane.xlu1 %792  ;;  %v784_v60 = vpop.xlane.xlu2 %783 }
 0x366   : > { %v825_v49 = vsub.f32 %v695_v28, %v793_v47  ;;  %v826_v50 = vsub.f32 %v744_v29, %v793_v47  ;;  %v881_v28 = vmul.f32 1.442695, %v823_v58  ;;  %v883_v29 = vmul.f32 1.442695, %v824_v59 }
 0x367   : > { %v819_v23 = vsub.f32 %v1603_v20, %v784_v60  ;;  %v820_v38 = vsub.f32 %v1605_v21, %v784_v60 }
 0x368   : > { %v885_v52 = vmul.f32 1.442695, %v825_v49  ;;  %v887_v55 = vmul.f32 1.442695, %v826_v50 }
 0x369   : > { %v875_v45 = vmul.f32 1.442695, %v820_v38 }
 0x36a   : > { %1195 = vpow2.f32 %v885_v52 }
 0x36b   : > { %1197 = vpow2.f32 %v887_v55 }
 0x36d   : > { %v796_v51 = vpop.xlane.xlu1 %795  ;;  %v778_v39 = vpop.xlane.xlu2 %777 }
 0x36e   : > { %v827_v53 = vsub.f32 %v697_v32, %v796_v51  ;;  %v828_v54 = vsub.f32 %v746_v33, %v796_v51  ;;  %v879_v33 = vmul.f32 1.442695, %v822_v24  ;;  %v815_v21 = vsub.f32 %v1595_v16, %v778_v39 }
 0x36f   : > { %v816_v50 = vsub.f32 %v1597_v17, %v778_v39 }
 0x370   : > { %v889_v56 = vmul.f32 1.442695, %v827_v53  ;;  %v891_v57 = vmul.f32 1.442695, %v828_v54  ;;  %v1196_v30 = vpop.eup %1195 }
 0x371   : > { %v1198_v32 = vpop.eup %1197 }
 0x372   : > { %1199 = vpow2.f32 %v889_v56 }
 0x373   : > { %1201 = vpow2.f32 %v891_v57  ;;  %v867_v57 = vmul.f32 1.442695, %v816_v50 }
 0x374   : > { %1203 = vpow2.f32 %v881_v28 }
 0x375   : > { %v781_v27 = vpop.xlane.xlu1 %780  ;;  %1205 = vpow2.f32 %v883_v29  ;;  %v772_v53 = vpop.xlane.xlu2 %771 }
 0x376   : > { %v817_v25 = vsub.f32 %v1599_v18, %v781_v27  ;;  %v818_v36 = vsub.f32 %v1601_v19, %v781_v27  ;;  %1207 = vpow2.f32 %v877_v31  ;;  %v873_v18 = vmul.f32 1.442695, %v819_v23 }
 0x377   : > { %1209 = vpow2.f32 %v879_v33  ;;  %v811_v17 = vsub.f32 %v1587_v12, %v772_v53  ;;  %v812_v24 = vsub.f32 %v1589_v13, %v772_v53 }
 0x378   : > { %v1200_v34 = vpop.eup %1199  ;;  %v869_v41 = vmul.f32 1.442695, %v817_v25  ;;  %v871_v42 = vmul.f32 1.442695, %v818_v36 }
 0x379   : > { %v1202_v26 = vpop.eup %1201  ;;  %v907_v22 = vpack.c.bf16 %v1200_v34, %v1196_v30  ;;  %v857_v31 = vmul.f32 1.442695, %v811_v17 }
 0x37a   : > { %v908_v37 = vpack.c.bf16 %v1202_v26, %v1198_v32  ;;  %v1204_v43 = vpop.eup %1203  ;;  %1211 = vpow2.f32 %v869_v41  ;;  %v859_v32 = vmul.f32 1.442695, %v812_v24  ;;  %v757_v41 = vpop.xlane.xlu0 %756 }
 0x37b   : > { %917 = vmatpush.bf16.xpose.msra.mxu3 %v907_v22  ;;  %v1206_v44 = vpop.eup %1205  ;;  %1213 = vpow2.f32 %v871_v42 }
 0x37c   : > { %930 = vmatpush.bf16.xpose.msrb.mxu0 %v908_v37  ;;  %v1208_v46 = vpop.eup %1207  ;;  %1215 = vpow2.f32 %v873_v18 }
 0x37d   : > { %v775_v40 = vpop.xlane.xlu1 %774  ;;  %v1210_v47 = vpop.eup %1209  ;;  %v905_v48 = vpack.c.bf16 %v1204_v43, %v1208_v46  ;;  %1217 = vpow2.f32 %v875_v45  ;;  %v802_v46 = vsub.f32 %v1567_v2, %v757_v41 }
 0x37e   : > { %v813_v19 = vsub.f32 %v1591_v14, %v775_v40  ;;  %v814_v20 = vsub.f32 %v1593_v15, %v775_v40  ;;  %v906_v49 = vpack.c.bf16 %v1206_v44, %v1210_v47  ;;  %v865_v14 = vmul.f32 1.442695, %v815_v21  ;;  %v766_v33 = vpop.xlane.xlu2 %765 }
 0x37f   : > { %v807_v13 = vsub.f32 %v1579_v8, %v766_v33  ;;  %v808_v22 = vsub.f32 %v1581_v9, %v766_v33  ;;  %v801_v9 = vsub.f32 %v1565_v1, %v757_v41 }
 0x380   : > { %v861_v52 = vmul.f32 1.442695, %v813_v19  ;;  %v863_v54 = vmul.f32 1.442695, %v814_v20  ;;  %v1212_v55 = vpop.eup %1211  ;;  %v947_v19 = vld [vmem:[%s1719_s5] sm:$0xf] }
 0x381   : > { %v1214_v56 = vpop.eup %1213  ;;  %v849_v40 = vmul.f32 1.442695, %v807_v13  ;;  %v851_v42 = vmul.f32 1.442695, %v808_v22  ;;  %950 = vperm.xlu2 %1194, %v947_v19  }
 0x382   : > { %v1216_v58 = vpop.eup %1215  ;;  %1219 = vpow2.f32 %v861_v52 }
 0x383   : > { %918 = vmatpush.bf16.xpose.msra.mxu3 %v905_v48  ;;  %v1218_v59 = vpop.eup %1217  ;;  %1221 = vpow2.f32 %v863_v54  ;;  %v903_v60 = vpack.c.bf16 %v1216_v58, %v1212_v55 }
 0x384   : > { %931 = vmatpush.bf16.xpose.msrb.mxu0 %v906_v49  ;;  %1223 = vpow2.f32 %v865_v14  ;;  %v904_v3 = vpack.c.bf16 %v1218_v59, %v1214_v56  ;;  %v839_v49 = vmul.f32 1.442695, %v802_v46 }
 0x385   : > { %v769_v51 = vpop.xlane.xlu1 %768  ;;  %1225 = vpow2.f32 %v867_v57 }
 0x386   : > { %v809_v15 = vsub.f32 %v1583_v10, %v769_v51  ;;  %v810_v16 = vsub.f32 %v1585_v11, %v769_v51  ;;  %v751_v1 = vpop.xlane.xlu2 %750 }
 0x387   : > { %v797_v54 = vsub.f32 %v1557_v61, %v751_v1  ;;  %v798_v14 = vsub.f32 %v1559_v62, %v751_v1 }
 0x388   : > { %v853_v28 = vmul.f32 1.442695, %v809_v15  ;;  %v855_v29 = vmul.f32 1.442695, %v810_v16  ;;  %v1220_v30 = vpop.eup %1219 }
 0x389   : > { %v1222_v10 = vpop.eup %1221  ;;  %v829_v15 = vmul.f32 1.442695, %v797_v54 }
 0x38a   : > { %v1224_v34 = vpop.eup %1223  ;;  %1227 = vpow2.f32 %v853_v28 }
 0x38b   : > { %919 = vmatpush.bf16.xpose.msra.mxu3 %v903_v60  ;;  %v1226_v25 = vpop.eup %1225  ;;  %1229 = vpow2.f32 %v855_v29  ;;  %v901_v26 = vpack.c.bf16 %v1224_v34, %v1220_v30 }
 0x38c   : > { %932 = vmatpush.bf16.xpose.msrb.mxu0 %v904_v3  ;;  %1231 = vpow2.f32 %v857_v31  ;;  %v902_v36 = vpack.c.bf16 %v1226_v25, %v1222_v10  ;;  %v909_v3 = vld [vmem:[#allocation3] sm:$0x77] }
 0x38d   : > { %v763_v27 = vpop.xlane.xlu1 %762  ;;  %1233 = vpow2.f32 %v859_v32  ;;  %v911_v30 = vunpack.c.l.b16 %v909_v3  ;;  %v912_v31 = vunpack.c.h.b16 %v909_v3 }
 0x38e   : > { %v805_v11 = vsub.f32 %v1575_v6, %v763_v27  ;;  %v806_v12 = vsub.f32 %v1577_v7, %v763_v27 }
 0x38f   : > { %v913_v10 = vpack.c.b16 %v911_v30, %v911_v30  ;;  %v914_v32 = vpack.c.b16 %v912_v31, %v912_v31 }
 0x390   : > { %v845_v37 = vmul.f32 1.442695, %v805_v11  ;;  %v847_v38 = vmul.f32 1.442695, %v806_v12  ;;  %v1228_v39 = vpop.eup %1227 }
 0x391   : > { %v1230_v6 = vpop.eup %1229 }
 0x392   : > { %v1232_v43 = vpop.eup %1231  ;;  %1235 = vpow2.f32 %v845_v37 }
 0x393   : > { %920 = vmatpush.bf16.xpose.msra.mxu3 %v901_v26  ;;  %v1234_v18 = vpop.eup %1233  ;;  %1237 = vpow2.f32 %v847_v38  ;;  %v899_v44 = vpack.c.bf16 %v1232_v43, %v1228_v39 }
 0x394   : > { %933 = vmatpush.bf16.xpose.msrb.mxu0 %v902_v36  ;;  %1239 = vpow2.f32 %v849_v40  ;;  %v900_v45 = vpack.c.bf16 %v1234_v18, %v1230_v6 }
 0x395   : > { %v760_v23 = vpop.xlane.xlu1 %759  ;;  %1241 = vpow2.f32 %v851_v42 }
 0x396   : > { %v803_v7 = vsub.f32 %v1571_v4, %v760_v23  ;;  %v804_v8 = vsub.f32 %v1573_v5, %v760_v23  ;;  %v837_v5 = vmul.f32 1.442695, %v801_v9  ;;  %v954_v23 = vstv %s944_s15 }
 0x398   : > { %v841_v47 = vmul.f32 1.442695, %v803_v7  ;;  %v843_v4 = vmul.f32 1.442695, %v804_v8  ;;  %v1236_v48 = vpop.eup %1235 }
 0x399   : > { %v1238_v21 = vpop.eup %1237 }
 0x39a   : > { %v1240_v50 = vpop.eup %1239  ;;  %1243 = vpow2.f32 %v841_v47 }
 0x39b   : > { %921 = vmatpush.bf16.xpose.msra.mxu3 %v899_v44  ;;  %v1242_v51 = vpop.eup %1241  ;;  %1245 = vpow2.f32 %v843_v4  ;;  %v897_v53 = vpack.c.bf16 %v1240_v50, %v1236_v48 }
 0x39c   : > { %934 = vmatpush.bf16.xpose.msrb.mxu0 %v900_v45  ;;  %1247 = vpow2.f32 %v837_v5  ;;  %v898_v55 = vpack.c.bf16 %v1242_v51, %v1238_v21 }
 0x39d   : > { %v754_v20 = vpop.xlane.xlu1 %753  ;;  %1249 = vpow2.f32 %v839_v49 }
 0x39e   : > { %v799_v2 = vsub.f32 %v1561_v63, %v754_v20  ;;  %v800_v52 = vsub.f32 %v1563_v0, %v754_v20  ;;  %v831_v63 = vmul.f32 1.442695, %v798_v14 }
 0x3a0   : > { %v833_v56 = vmul.f32 1.442695, %v799_v2  ;;  %v835_v57 = vmul.f32 1.442695, %v800_v52  ;;  %v1244_v58 = vpop.eup %1243 }
 0x3a1   : > { %v1246_v59 = vpop.eup %1245 }
 0x3a2   : > { %v1248_v16 = vpop.eup %1247  ;;  %1251 = vpow2.f32 %v833_v56 }
 0x3a3   : > { %922 = vmatpush.bf16.xpose.msra.mxu3 %v897_v53  ;;  %v1250_v60 = vpop.eup %1249  ;;  %1253 = vpow2.f32 %v835_v57  ;;  %v895_v0 = vpack.c.bf16 %v1244_v58, %v1248_v16 }
 0x3a4   : > { %935 = vmatpush.bf16.xpose.msrb.mxu0 %v898_v55  ;;  %1255 = vpow2.f32 %v829_v15  ;;  %v896_v17 = vpack.c.bf16 %v1246_v59, %v1250_v60 }
 0x3a5   : > { %1257 = vpow2.f32 %v831_v63 }
 0x3a8   : > { %v1252_v61 = vpop.eup %1251 }
 0x3a9   : > { %v1254_v62 = vpop.eup %1253 }
 0x3aa   : > { %v1256_v24 = vpop.eup %1255 }
 0x3ab   : > { %923 = vmatpush.bf16.xpose.msra.mxu3 %v895_v0  ;;  %v1258_v27 = vpop.eup %1257  ;;  %v893_v28 = vpack.c.bf16 %v1252_v61, %v1256_v24 }
 0x3ac   : > { %936 = vmatpush.bf16.xpose.msrb.mxu0 %v896_v17  ;;  %v894_v29 = vpack.c.bf16 %v1254_v62, %v1258_v27 }
 0x3b3   : > { %924 = vmatpush.bf16.xpose.msra.mxu3 %v893_v28 }
 0x3b4   : > { %937 = vmatpush.bf16.xpose.msrb.mxu0 %v894_v29 }
 0x3ba   : > { %925 = vmatmul.bf16.vlgmr.msra.gmra.mxu3 %v913_v10 }
 0x3bb   : > { %938 = vmatmul.bf16.vlgmr.msrb.gmra.mxu0 %v914_v32 }
 0x3db   : > { %v951_v36 = vpop.permute.xlu2 %950 }
 0x438   : > { %v939_v33 = vpop.f32.mrf.mxu0 }
 0x43d   : > { %v926_v34 = vpop.f32.mrf.mxu3 }
 0x43e   : > { %v940_v11 = vadd.f32 %v939_v33, %v926_v34 }
 0x440   : > { %1259 = vrcp.f32 %v940_v11  ;;  %v941_v25 = vpop.f32.mrf.mxu0 }
 0x445   : > { %v928_v12 = vpop.f32.mrf.mxu3 }
 0x446   : > { %v1260_v26 = vpop.eup %1259 }
 0x447   : > { %v945_v13 = vperm.slane %v1260_v26, 4 }
 0x449   : > { %v946_v22 = vmul.f32 %v945_v13, %v940_v11 }
 0x44b   : > { %v953_v37 = vadd.f32 %v951_v36, %v946_v22 }
 0x44d   : > { %v955_v38 = vmul.f32 %v954_v23, %v953_v37 }
 0x44f   : > { %v956_v39 = vadd.f32 %v955_v38, %v1531_v35 }
 0x451   : > { %957 = vst [vmem:[%s432_s11] sm:$0xf] %v956_v39 }
 0x452   : > { %1288 = shalt.err (!%p1285_p9)
}
 0x453   : > { %1119 = dma.vmem_to_hbm [thread:$0]  (%p1473_p3), %s974_s17, 64, %s976_s23, %s959_s18  }
 0x454 PF: > { %s1756_s11 = sld [smem:[#allocation12_spill]] }
 0x455   : > { %s1757_s10 = sld [smem:[#allocation8_spill]] }
 0x45a   : > { %p1125_p10 = scmp.ge.s32.totalorder %s1756_s11, 2 }
 0x45b   : > { %s987_s24 = sand.u32 1, %s1757_s10  }
 0x45c   : > { %p1122_p11 = pnand %p1125_p10, %p1482_p8  ;;  %s988_s26 = scalar_lea.sflag [#allocation6], %s987_s24 }
 0x45e   : > { %p1123_p12 = pneg %p1122_p11 }
 0x460   : > { %1322 = dma.done.wait (%p1123_p12), %s988_s26, 64  }
 0x461   : > { %1324 = vsyncadd (%p1123_p12), %s988_s26, 4294967232  ;;  %s25_s26 = sadd.s32 1, %s1756_s11   ;;  %s1759_s25 = sld [smem:[#allocation9_spill]] }
 0x462   : > { %p22_p13 = scmp.ge.s32.totalorder %s25_s26, 6   ;;  %s1760_s21 = sld [smem:[#allocation17_spill]] }
 0x463   : > { %s1761_s22 = sld [smem:[#allocation10_spill]]  ;;  %s1765_s19 = smov %s1331_s20 }
 0x464   : > { %s1762_s23 = sld [smem:[#allocation11_spill]] }
 0x465   : > { %s1763_s24 = sld [smem:[#allocation13_spill]] }
 0x466   : > { %s1764_s12 = sld [smem:[#allocation15_spill]] }
 0x467   : > { %s1766_s20 = smov %s1759_s25 }
 0x468   :  { %24 = sbr.rel (!%p22_p13) target bundleno = 8 (0x8), region = 109 }
 0x46c   : > { %s1767_s25 = smov %s1764_s12 }
 0x46d   :  { %994 = vsyncpa [#allocation6], 1 }
 0x46e   :  { %996 = vsyncpa [#allocation6 + $0x1], 1 }

</bundles_post_ra>
